<compile_context>
chip_gen: v5e
topology: v5e:2x2
jax: 0.10.0
libtpu: 0.0.40
codegen_flags: <defaults>
</compile_context>

<pallas_src>
import functools
import math

import jax
import jax.numpy as jnp
from jax.experimental import pallas as pl
from jax.experimental.pallas import tpu as pltpu

_LANE = 128


def _round_up(x, m):
    return ((x + m - 1) // m) * m


def _mhsa_kernel(h_ref, w_ref, o_ref, *, num_heads, hd_pad, o_pad, compute_dtype):
    """One batch block: all heads, fused (lane-padded) Q/K/V projection.

    h_ref : (BBLK, S, F)               features for this batch block
    w_ref : (F, NH*2*HDp + NH*Op)      stacked [Wq_all | Wk_all | Wv_all] in
                                       (F, N) layout, per-head columns padded
                                       to 128 lanes, Wq pre-scaled by 1/sqrt(F)
    o_ref : (BBLK, S, NH*Op)           lane-dense padded output slab
    """
    bblk, s, f = h_ref.shape

    # Fused projection: BBLK*S rows fill the MXU M dimension (single matmul,
    # f32 accumulation; bf16 operands when use_bf16=True).
    h2 = h_ref[...].reshape(bblk * s, f)
    proj = jnp.dot(h2, w_ref[...], preferred_element_type=jnp.float32)
    proj = proj.reshape(bblk, s, proj.shape[-1])                 # (BBLK, S, Ntot)

    nq = num_heads * hd_pad
    nk = num_heads * hd_pad

    for h in range(num_heads):                                    # static unroll (small NH)
        # 128-aligned, 128-multiple-wide static slices -> free views, no masks.
        q = proj[:, :, h * hd_pad:(h + 1) * hd_pad].astype(compute_dtype)
        k = proj[:, :, nq + h * hd_pad: nq + (h + 1) * hd_pad].astype(compute_dtype)
        v = proj[:, :, nq + nk + h * o_pad: nq + nk + (h + 1) * o_pad].astype(compute_dtype)

        # scores = q @ k^T, batched over the block's batch dim (no transpose
        # materialized); bf16 MXU inputs when use_bf16, always f32 accumulation.
        scores = jnp.einsum("bqd,bkd->bqk", q, k,
                            preferred_element_type=jnp.float32)   # (BBLK, S, S)

        # Numerically-stable softmax in f32; the divide is deferred and folded
        # into the (S, Op) output via an exact EUP reciprocal.
        m = jnp.max(scores, axis=-1, keepdims=True)
        e = jnp.exp(scores - m)                                    # (BBLK, S, S) f32
        denom = jnp.sum(e, axis=-1, keepdims=True)                 # (BBLK, S, 1)

        out_h = jnp.einsum("bqk,bkd->bqd", e.astype(compute_dtype), v,
                           preferred_element_type=jnp.float32)     # (BBLK, S, Op)
        out_h = out_h * pl.reciprocal(denom, approx=False)

        # Lane-dense store at a static 128-aligned lane offset (no concatenate).
        o_ref[:, :, h * o_pad:(h + 1) * o_pad] = out_h.astype(o_ref.dtype)


def multi_head_self_attention(features, wq, wk, wv, *, use_bf16=False):
    """features: (B, S, F); wq/wk: (NH, HD, F); wv: (NH, O, F)
    returns: (B, S, NH * O)  -- heads concatenated along the last dim."""
    B, S, F = features.shape
    NH, HD, _ = wq.shape
    O = wv.shape[1]

    hd_pad = _round_up(HD, _LANE)
    o_pad = _round_up(O, _LANE)

    inv_sqrt_f = 1.0 / math.sqrt(F)   # torch: A /= features.shape[-1] ** 0.5

    # One-time wrapper-side weight prep:
    #  * (F, N) layout so the kernel never transposes,
    #  * per-head columns zero-padded to 128-lane multiples (zero columns are
    #    exact: they contribute nothing to q.k and produce zero output lanes),
    #  * 1/sqrt(F) temperature baked into the query weights,
    #  * single (F, Ntot) slab -> one fused projection matmul.
    def stack(w, scale, pad_to):
        nh, n, _ = w.shape
        wt = jnp.transpose(w * scale, (2, 0, 1))               # (F, NH, n)
        wt = jnp.pad(wt, ((0, 0), (0, 0), (0, pad_to - n)))     # zero-pad lanes
        return wt.reshape(F, nh * pad_to)

    wq_all = stack(wq, inv_sqrt_f, hd_pad)    # (F, NH*HDp)
    wk_all = stack(wk, 1.0, hd_pad)           # (F, NH*HDp)
    wv_all = stack(wv, 1.0, o_pad)            # (F, NH*Op)
    w_all = jnp.concatenate([wq_all, wk_all, wv_all], axis=1)   # (F, Ntot)
    n_tot = w_all.shape[1]

    in_dtype = jnp.bfloat16 if use_bf16 else jnp.float32
    compute_dtype = jnp.bfloat16 if use_bf16 else jnp.float32
    out_dtype = jnp.bfloat16 if use_bf16 else jnp.float32

    features = features.astype(in_dtype)
    w_all = w_all.astype(in_dtype)

    # Block several batch elements per grid step so BBLK*S rows fill the MXU M
    # dimension and the per-step grid overhead is amortized.  BBLK divides B.
    bblk = max(1, min(B, 256 // max(S, 1)))
    while B % bblk:
        bblk -= 1
    grid = (B // bblk,)

    kernel = functools.partial(_mhsa_kernel, num_heads=NH, hd_pad=hd_pad,
                               o_pad=o_pad, compute_dtype=compute_dtype)

    # Advisory cost estimate so XLA schedules the custom call sensibly.
    in_item = jnp.dtype(in_dtype).itemsize
    out_item = jnp.dtype(out_dtype).itemsize
    flops = 2 * B * S * F * n_tot + 2 * B * NH * S * S * (hd_pad + o_pad)
    bytes_accessed = (B * S * F * in_item + F * n_tot * in_item
                      + B * S * NH * o_pad * out_item)
    cost = pl.CostEstimate(flops=flops, transcendentals=B * NH * S * S,
                           bytes_accessed=bytes_accessed)

    out = pl.pallas_call(
        kernel,
        out_shape=jax.ShapeDtypeStruct((B, S, NH * o_pad), out_dtype),
        grid_spec=pltpu.PrefetchScalarGridSpec(
            num_scalar_prefetch=0,
            grid=grid,
            in_specs=[
                pl.BlockSpec((bblk, S, F), lambda b: (b, 0, 0)),   # features block
                # Constant block index across the grid -> weights stay resident
                # in VMEM and are never re-DMA'd.  (Single-buffering the slab
                # via pipeline_mode is a further VMEM saving for large F*Ntot.)
                pl.BlockSpec((F, n_tot), lambda b: (0, 0)),
            ],
            out_specs=pl.BlockSpec((bblk, S, NH * o_pad), lambda b: (b, 0, 0)),
        ),
        compiler_params=pltpu.CompilerParams(
            dimension_semantics=("parallel",),
            # Above v5e's 16 MiB scoped default; safely under v7x's 64 MiB VMEM.
            vmem_limit_bytes=32 * 1024 * 1024,
        ),
        cost_estimate=cost,
    )(features, w_all)

    # Slice the per-head lane padding off outside the kernel.
    out = out.reshape(B, S, NH, o_pad)[..., :O].reshape(B, S, NH * O)
    return out


def _reference(features, wq, wk, wv):
    """Pure-JAX reference mirroring the PyTorch module exactly."""
    B, S, F = features.shape
    outs = []
    for h in range(wq.shape[0]):
        q = features @ wq[h].T
        k = features @ wk[h].T
        v = features @ wv[h].T
        A = (q @ jnp.swapaxes(k, -2, -1)) / math.sqrt(F)
        A = jax.nn.softmax(A, axis=-1)
        outs.append(A @ v)
    return jnp.concatenate(outs, axis=-1)


if __name__ == "__main__":
    # Small shapes consistent with the module's forward.
    batch = 2
    seq = 8
    feature_size = 16
    hidden_dim = 32
    output_size = 8
    num_heads = 2

    key = jax.random.PRNGKey(0)
    k_x, k_q, k_k, k_v = jax.random.split(key, 4)

    features = jax.random.normal(k_x, (batch, seq, feature_size), jnp.float32)

    # Deterministic parameter init mimicking nn.Linear's U(-1/sqrt(fan_in), +).
    bound = 1.0 / math.sqrt(feature_size)
    wq = jax.random.uniform(k_q, (num_heads, hidden_dim, feature_size),
                            jnp.float32, -bound, bound)
    wk = jax.random.uniform(k_k, (num_heads, hidden_dim, feature_size),
                            jnp.float32, -bound, bound)
    wv = jax.random.uniform(k_v, (num_heads, output_size, feature_size),
                            jnp.float32, -bound, bound)

    ref = _reference(features, wq, wk, wv)

    # f32 path. Tolerance covers differing f32-matmul pass decompositions
    # between the Mosaic kernel and the XLA reference (not the reciprocal,
    # which is exact here).
    out_f32 = jax.block_until_ready(multi_head_self_attention(features, wq, wk, wv))
    assert out_f32.shape == (batch, seq, num_heads * output_size), out_f32.shape
    assert jnp.allclose(out_f32, ref, atol=2e-3, rtol=2e-3), "f32 mismatch vs reference"

    # bf16-MXU path (bf16 dot operands, f32 accumulation): looser tolerance.
    out_bf16 = jax.block_until_ready(
        multi_head_self_attention(features, wq, wk, wv, use_bf16=True))
    assert out_bf16.shape == (batch, seq, num_heads * output_size), out_bf16.shape
    assert jnp.allclose(out_bf16.astype(jnp.float32), ref, atol=5e-2, rtol=5e-2), \
        "bf16 mismatch vs reference"

    print("KERNEL_OK")
</pallas_src>

<mosaic_0001>
module attributes {stable_mosaic.version = 11 : i64} {
  func.func @_mhsa_kernel(%arg0: i32, %arg1: memref<2x8x16xf32, #tpu.memory_space<vmem>>, %arg2: memref<16x768xf32, #tpu.memory_space<vmem>>, %arg3: memref<2x8x256xf32, #tpu.memory_space<vmem>>) attributes {dimension_semantics = [#tpu.dimension_semantics<parallel>], iteration_bounds = array<i64: 1>, scalar_prefetch = 0 : i64, scratch_operands = 0 : i64, tpu.core_type = #tpu.core_type<tc>, window_params = [{transform_indices = @transform_0, window_bounds = array<i64: 2, 8, 16>}, {pipeline_mode = #tpu.pipeline_mode<synchronous>, transform_indices = @transform_1, window_bounds = array<i64: 16, 768>}, {transform_indices = @transform_2, window_bounds = array<i64: 2, 8, 256>}]} {
    %c0 = arith.constant 0 : index
    %c0_0 = arith.constant 0 : index
    %c0_1 = arith.constant 0 : index
    %0 = vector.load %arg1[%c0, %c0_0, %c0_1] : memref<2x8x16xf32, #tpu.memory_space<vmem>>, vector<2x8x16xf32>
    %1 = vector.shape_cast %0 : vector<2x8x16xf32> to vector<16x16xf32>
    %c0_2 = arith.constant 0 : index
    %c0_3 = arith.constant 0 : index
    %2 = vector.load %arg2[%c0_2, %c0_3] : memref<16x768xf32, #tpu.memory_space<vmem>>, vector<16x768xf32>
    %cst = arith.constant dense<0.000000e+00> : vector<16x768xf32>
    %3 = tpu.matmul %1, %2, %cst {dimension_numbers = #tpu.dot_dimension_numbers<[1], [0], [0], [1], [0, 0, 1, 1], [], []>} : vector<16x16xf32>, vector<16x768xf32>, vector<16x768xf32> -> vector<16x768xf32>
    %4 = vector.shape_cast %3 : vector<16x768xf32> to vector<2x8x768xf32>
    %5 = vector.extract_strided_slice %4 {offsets = [0, 0, 0], sizes = [2, 8, 128], strides = [1, 1, 1]} : vector<2x8x768xf32> to vector<2x8x128xf32>
    %6 = vector.extract_strided_slice %4 {offsets = [0, 0, 256], sizes = [2, 8, 128], strides = [1, 1, 1]} : vector<2x8x768xf32> to vector<2x8x128xf32>
    %7 = vector.extract_strided_slice %4 {offsets = [0, 0, 512], sizes = [2, 8, 128], strides = [1, 1, 1]} : vector<2x8x768xf32> to vector<2x8x128xf32>
    "tpu.trace_start"() <{level = 10 : i32, message = "bqd,bkd->bqk"}> : () -> ()
    %cst_4 = arith.constant dense<0.000000e+00> : vector<2x8x8xf32>
    %8 = tpu.matmul %5, %6, %cst_4 {dimension_numbers = #tpu.dot_dimension_numbers<[2], [2], [1], [1], [0, 0, 0, 1, 1, 1], [0], [0]>} : vector<2x8x128xf32>, vector<2x8x128xf32>, vector<2x8x8xf32> -> vector<2x8x8xf32>
    "tpu.trace_stop"() : () -> ()
    %cst_5 = arith.constant dense<0xFF800000> : vector<2x8xf32>
    %9 = vector.multi_reduction <maximumf>, %8, %cst_5 [2] : vector<2x8x8xf32> to vector<2x8xf32>
    %10 = vector.shape_cast %9 : vector<2x8xf32> to vector<2x8x1xf32>
    %11 = vector.broadcast %10 : vector<2x8x1xf32> to vector<2x8x8xf32>
    %12 = arith.subf %8, %11 : vector<2x8x8xf32>
    %13 = math.exp %12 : vector<2x8x8xf32>
    %cst_6 = arith.constant dense<0.000000e+00> : vector<2x8xf32>
    %14 = vector.multi_reduction <add>, %13, %cst_6 [2] : vector<2x8x8xf32> to vector<2x8xf32>
    %15 = vector.shape_cast %14 : vector<2x8xf32> to vector<2x8x1xf32>
    "tpu.trace_start"() <{level = 10 : i32, message = "bqk,bkd->bqd"}> : () -> ()
    %cst_7 = arith.constant dense<0.000000e+00> : vector<2x8x128xf32>
    %16 = tpu.matmul %13, %7, %cst_7 {dimension_numbers = #tpu.dot_dimension_numbers<[2], [1], [1], [2], [0, 0, 0, 1, 1, 2], [0], [0]>} : vector<2x8x8xf32>, vector<2x8x128xf32>, vector<2x8x128xf32> -> vector<2x8x128xf32>
    "tpu.trace_stop"() : () -> ()
    %17 = tpu.reciprocal %15 : vector<2x8x1xf32> -> vector<2x8x1xf32>
    %18 = vector.broadcast %17 : vector<2x8x1xf32> to vector<2x8x128xf32>
    %19 = arith.mulf %16, %18 : vector<2x8x128xf32>
    %c0_8 = arith.constant 0 : index
    %c0_9 = arith.constant 0 : index
    %c0_10 = arith.constant 0 : index
    %20 = vector.load %arg3[%c0_8, %c0_9, %c0_10] : memref<2x8x256xf32, #tpu.memory_space<vmem>>, vector<2x8x128xf32>
    tpu.vector_store %arg3[%c0_8, %c0_9, %c0_10], %19 {strides = array<i32>} : memref<2x8x256xf32, #tpu.memory_space<vmem>>, vector<2x8x128xf32>,
    %21 = vector.extract_strided_slice %4 {offsets = [0, 0, 128], sizes = [2, 8, 128], strides = [1, 1, 1]} : vector<2x8x768xf32> to vector<2x8x128xf32>
    %22 = vector.extract_strided_slice %4 {offsets = [0, 0, 384], sizes = [2, 8, 128], strides = [1, 1, 1]} : vector<2x8x768xf32> to vector<2x8x128xf32>
    %23 = vector.extract_strided_slice %4 {offsets = [0, 0, 640], sizes = [2, 8, 128], strides = [1, 1, 1]} : vector<2x8x768xf32> to vector<2x8x128xf32>
    "tpu.trace_start"() <{level = 10 : i32, message = "bqd,bkd->bqk"}> : () -> ()
    %cst_11 = arith.constant dense<0.000000e+00> : vector<2x8x8xf32>
    %24 = tpu.matmul %21, %22, %cst_11 {dimension_numbers = #tpu.dot_dimension_numbers<[2], [2], [1], [1], [0, 0, 0, 1, 1, 1], [0], [0]>} : vector<2x8x128xf32>, vector<2x8x128xf32>, vector<2x8x8xf32> -> vector<2x8x8xf32>
    "tpu.trace_stop"() : () -> ()
    %cst_12 = arith.constant dense<0xFF800000> : vector<2x8xf32>
    %25 = vector.multi_reduction <maximumf>, %24, %cst_12 [2] : vector<2x8x8xf32> to vector<2x8xf32>
    %26 = vector.shape_cast %25 : vector<2x8xf32> to vector<2x8x1xf32>
    %27 = vector.broadcast %26 : vector<2x8x1xf32> to vector<2x8x8xf32>
    %28 = arith.subf %24, %27 : vector<2x8x8xf32>
    %29 = math.exp %28 : vector<2x8x8xf32>
    %cst_13 = arith.constant dense<0.000000e+00> : vector<2x8xf32>
    %30 = vector.multi_reduction <add>, %29, %cst_13 [2] : vector<2x8x8xf32> to vector<2x8xf32>
    %31 = vector.shape_cast %30 : vector<2x8xf32> to vector<2x8x1xf32>
    "tpu.trace_start"() <{level = 10 : i32, message = "bqk,bkd->bqd"}> : () -> ()
    %cst_14 = arith.constant dense<0.000000e+00> : vector<2x8x128xf32>
    %32 = tpu.matmul %29, %23, %cst_14 {dimension_numbers = #tpu.dot_dimension_numbers<[2], [1], [1], [2], [0, 0, 0, 1, 1, 2], [0], [0]>} : vector<2x8x8xf32>, vector<2x8x128xf32>, vector<2x8x128xf32> -> vector<2x8x128xf32>
    "tpu.trace_stop"() : () -> ()
    %33 = tpu.reciprocal %31 : vector<2x8x1xf32> -> vector<2x8x1xf32>
    %34 = vector.broadcast %33 : vector<2x8x1xf32> to vector<2x8x128xf32>
    %35 = arith.mulf %32, %34 : vector<2x8x128xf32>
    %c0_15 = arith.constant 0 : index
    %c0_16 = arith.constant 0 : index
    %c128 = arith.constant 128 : index
    %36 = vector.load %arg3[%c0_15, %c0_16, %c128] : memref<2x8x256xf32, #tpu.memory_space<vmem>>, vector<2x8x128xf32>
    tpu.vector_store %arg3[%c0_15, %c0_16, %c128], %35 {strides = array<i32>} : memref<2x8x256xf32, #tpu.memory_space<vmem>>, vector<2x8x128xf32>,
    return
  }
  func.func @transform_0(%arg0: i32) -> (i32, i32, i32) {
    %c0_i32 = arith.constant 0 : i32
    %c0_i32_0 = arith.constant 0 : i32
    %c0_i32_1 = arith.constant 0 : i32
    return %arg0, %c0_i32, %c0_i32_0 : i32, i32, i32
  }
  func.func @transform_1(%arg0: i32) -> (i32, i32) {
    %c0_i32 = arith.constant 0 : i32
    %c0_i32_0 = arith.constant 0 : i32
    %c0_i32_1 = arith.constant 0 : i32
    return %c0_i32, %c0_i32_0 : i32, i32
  }
  func.func @transform_2(%arg0: i32) -> (i32, i32, i32) {
    %c0_i32 = arith.constant 0 : i32
    %c0_i32_0 = arith.constant 0 : i32
    %c0_i32_1 = arith.constant 0 : i32
    return %arg0, %c0_i32, %c0_i32_0 : i32, i32, i32
  }
}

</mosaic_0001>

<bundles_post_ra>
// kernel: tpu_custom_call.1
= control target key start
LH: loop header
LB: loop body
LE: loop exit
PB: predicated region body
PF: predicated region fallthrough
CT: control target
= control target key end

     0   :  { %7 = vsyncpa [#allocation3], 0  ;;  %s686_s0 = inlined_call_operand.hbm [shape: f32[2,8,16], index: 0, kind: input, shape index: {}]   ;;  %s687_s1 = inlined_call_operand.hbm [shape: f32[16,768], index: 1, kind: input, shape index: {}]   ;;  %s688_s2 = inlined_call_operand.hbm [shape: f32[2,8,256], index: 2, kind: output, shape index: {}]  }
   0x1   :  { %8 = vsyncpa [#allocation6], 0 }
   0x2   :  { %9 = vsyncpa [#allocation4], 0  ;;  %s14_s11 = sshll.u32 %s686_s0, 4  ;;  %s615_s12 = smov [#allocation2]   ;;  %s15_s11 = int_to_ptr.hbm [resolvable:$true] %s14_s11 }
   0x3   :  { %s16_s13 = sshll.u32 %s615_s12, 4  ;;  %s27_s16 = sshll.u32 %s687_s1, 4  ;;  %s17_s13 = int_to_ptr.vmem [resolvable:$true] %s16_s13  ;;  %s28_s16 = int_to_ptr.hbm [resolvable:$true] %s27_s16 }
   0x4   :  { %s616_s17 = smov 128   ;;  %s617_s18 = smov 8  }
   0x5   :  { %22 = dma.hbm_to_vmem [thread:$0]  %s15_s11, 256, %s17_s13, [#allocation3], %s616_s17, %s616_s17, %s617_s18  }
   0x6   :  { %s618_s19 = smov [#allocation5]   ;;  %s619_s21 = smov 768  }
   0x7   :  { %s29_s20 = sshll.u32 %s618_s19, 4  ;;  %s620_s22 = smov 48   ;;  %s30_s20 = int_to_ptr.vmem [resolvable:$true] %s29_s20 }
   0x8   :  { %35 = dma.hbm_to_vmem [thread:$0]  %s28_s16, 1536, %s30_s20, [#allocation6], %s619_s21, %s619_s21, %s620_s22  }
   0x9   :  { %609 = dma.done.wait [#allocation3], 256  }
   0xa   :  { %610 = vsyncadd [#allocation3], 4294967040 }
   0xb   :  { %611 = dma.done.wait [#allocation6], 1536  }
   0xc   :  { %612 = vsyncadd [#allocation6], 4294965760  ;;  %v54_v0 = vld [vmem:[#allocation5 + $0x40] sm:$0xff]  ;;  %v55_v1 = vld [vmem:[#allocation5 + $0x48] sm:$0xff]  ;;  %vm58_vm0 = vcmask 130048   ;;  %vm243_vm1 = vcmask 64512  }
   0xd   :  { %v48_v2 = vld [vmem:[#allocation5 + $0x10] sm:$0xff]  ;;  %125 = vmatpush.msra.mxu2 %v54_v0  ;;  %148 = vmatpush.msra.mxu3 %v55_v1  ;;  %v49_v3 = vld [vmem:[#allocation5 + $0x18] sm:$0xff]  ;;  %v46_v7 = vld [vmem:[#allocation5] sm:$0xff]  ;;  %s621_s0 = smov [#allocation7]   ;;  %s482_s25 = sshll.u32 %s688_s2, 4  ;;  %s483_s25 = int_to_ptr.hbm [resolvable:$true] %s482_s25 }
   0xe   :  { %v44_v4 = vld [vmem:[#allocation2] sm:$0xff]  ;;  %v53_v6 = vld [vmem:[#allocation5 + $0x38] sm:$0xff]  ;;  %v47_v8 = vld [vmem:[#allocation5 + $0x8] sm:$0xff]  ;;  %s480_s1 = sshll.u32 %s621_s0, 4  ;;  %s622_s26 = smov 256   ;;  %s481_s1 = int_to_ptr.vmem [resolvable:$true] %s480_s1 }
   0xf   :  { %v52_v5 = vld [vmem:[#allocation5 + $0x30] sm:$0xff]  ;;  %126 = vmatpush.msra.mxu2 %v48_v2  ;;  %149 = vmatpush.msra.mxu3 %v49_v3  ;;  %v50_v10 = vld [vmem:[#allocation5 + $0x20] sm:$0xff]  ;;  %v57_v11 = vld [vmem:[#allocation5 + $0x58] sm:$0xff]  ;;  %s623_s27 = smov 16  }
  0x10   :  { %79 = vmatpush.msra.mxu0 %v52_v5  ;;  %500 = vmatmul.msk.f32.vlgmr.msra.gmra.mxu2 %vm58_vm0, %v44_v4  ;;  %v56_v9 = vld [vmem:[#allocation5 + $0x50] sm:$0xff]  ;;  %v51_v12 = vld [vmem:[#allocation5 + $0x28] sm:$0xff]  ;;  %v45_v13 = vld [vmem:[#allocation2 + $0x8] sm:$0xff] }
  0x11   :  { %502 = vmatmul.msk.f32.vlgmr.msra.gmra.mxu3 %vm58_vm0, %v44_v4  ;;  %102 = vmatpush.msra.mxu1 %v53_v6 }
  0x12   :  { %80 = vmatpush.msra.mxu0 %v46_v7 }
  0x13   :  { %496 = vmatmul.msk.f32.vlgmr.msra.gmra.mxu0 %vm58_vm0, %v44_v4  ;;  %103 = vmatpush.msra.mxu1 %v47_v8 }
  0x14   :  { %171 = vmatpush.msrb.mxu0 %v56_v9  ;;  %498 = vmatmul.msk.f32.vlgmr.msra.gmra.mxu1 %vm58_vm0, %v44_v4 }
  0x15   :  { %194 = vmatpush.msrb.mxu1 %v57_v11 }
  0x16   :  { %172 = vmatpush.msrb.mxu0 %v50_v10 }
  0x17   :  { %195 = vmatpush.msrb.mxu1 %v51_v12 }
  0x18   :  { %501 = vmatmul.msk.f32.gmra.mxu2 %vm58_vm0, %v45_v13 }
  0x19   :  { %503 = vmatmul.msk.f32.gmra.mxu3 %vm58_vm0, %v45_v13 }
  0x1b   :  { %497 = vmatmul.msk.f32.gmra.mxu0 %vm58_vm0, %v45_v13 }
  0x1c   :  { %499 = vmatmul.msk.f32.gmra.mxu1 %vm58_vm0, %v45_v13 }
  0x23   :  { %504 = vmatmul.msk.f32.vlgmr.msrb.gmra.mxu0 %vm58_vm0, %v44_v4 }
  0x24   :  { %506 = vmatmul.msk.f32.vlgmr.msrb.gmra.mxu1 %vm58_vm0, %v44_v4 }
  0x2b   :  { %505 = vmatmul.msk.f32.gmra.mxu0 %vm58_vm0, %v45_v13 }
  0x2c   :  { %507 = vmatmul.msk.f32.gmra.mxu1 %vm58_vm0, %v45_v13 }
  0x90   :  { %v82_v14 = vpop.f32.mrf.mxu0 }
  0x91   :  { %v105_v15 = vpop.f32.mrf.mxu1 }
  0x93   :  { %v128_v16 = vpop.f32.mrf.mxu2 }
  0x94   :  { %v151_v17 = vpop.f32.mrf.mxu3  ;;  %218 = vmatpush.xpose.msrb.mxu2 %v128_v16 }
  0x95   :  { %355 = vmatpush.xpose.msra.mxu0 %v151_v17 }
  0x97   :  { %219 = vmatmul.f32.vlgmr.msrb.gmra.mxu2 %v82_v14 }
  0x98   :  { %356 = vmatmul.f32.vlgmr.msra.gmra.mxu0 %v105_v15  ;;  %v85_v18 = vpop.f32.mrf.mxu0 }
  0x99   :  { %v108_v19 = vpop.f32.mrf.mxu1 }
  0x9b   :  { %v131_v20 = vpop.f32.mrf.mxu2 }
  0x9c   :  { %v154_v21 = vpop.f32.mrf.mxu3  ;;  %238 = vmatpush.xpose.msrb.mxu3 %v131_v20 }
  0x9d   :  { %375 = vmatpush.xpose.msra.mxu1 %v154_v21 }
  0x9f   :  { %239 = vmatmul.f32.vlgmr.msrb.gmra.mxu3 %v85_v18 }
  0xa0   :  { %376 = vmatmul.f32.vlgmr.msra.gmra.mxu1 %v108_v19  ;;  %v174_v22 = vpop.f32.mrf.mxu0 }
  0xa1   :  { %280 = vmatpush.msra.mxu2 %v174_v22  ;;  %v197_v23 = vpop.f32.mrf.mxu1 }
  0xa3   :  { %416 = vmatpush.msrb.mxu2 %v197_v23 }
  0xa8   :  { %v177_v24 = vpop.f32.mrf.mxu0 }
  0xa9   :  { %303 = vmatpush.msra.mxu3 %v177_v24  ;;  %v200_v25 = vpop.f32.mrf.mxu1 }
  0xab   :  { %439 = vmatpush.msrb.mxu3 %v200_v25 }
 0x115   :  { %v357_v26 = vpop.f32.mrf.mxu0 }
 0x116   :  { %v380_v27 = vsel %vm243_vm1, %v357_v26, -inf }
 0x117   :  { %381 = vmax.xlane.f32.xlu1 %v380_v27 }
 0x11a   :  { %v220_v28 = vpop.f32.mrf.mxu2 }
 0x11b   :  { %v244_v29 = vsel %vm243_vm1, %v220_v28, -inf }
 0x11c   :  { %245 = vmax.xlane.f32.xlu0 %v244_v29 }
 0x11d   :  { %v377_v30 = vpop.f32.mrf.mxu1 }
 0x11e   :  { %v383_v31 = vsel %vm243_vm1, %v377_v30, -inf }
 0x11f   :  { %384 = vmax.xlane.f32.xlu1 %v383_v31 }
 0x122   :  { %v240_v32 = vpop.f32.mrf.mxu3 }
 0x123   :  { %v247_v33 = vsel %vm243_vm1, %v240_v32, -inf }
 0x124   :  { %248 = vmax.xlane.f32.xlu0 %v247_v33 }
 0x18a   :  { %v382_v34 = vpop.xlane.xlu1 %381 }
 0x18b   :  { %v386_v35 = vsub.f32 %v357_v26, %v382_v34 }
 0x18d   :  { %v388_v36 = vmul.f32 1.442695, %v386_v35 }
 0x18f   :  { %521 = vpow2.f32 %v388_v36  ;;  %v246_v37 = vpop.xlane.xlu0 %245 }
 0x190   :  { %v250_v38 = vsub.f32 %v220_v28, %v246_v37 }
 0x192   :  { %v385_v39 = vpop.xlane.xlu1 %384  ;;  %v252_v40 = vmul.f32 1.442695, %v250_v38 }
 0x193   :  { %v387_v41 = vsub.f32 %v377_v30, %v385_v39 }
 0x194   :  { %523 = vpow2.f32 %v252_v40 }
 0x195   :  { %v522_v42 = vpop.eup %521  ;;  %v390_v43 = vmul.f32 1.442695, %v387_v41 }
 0x196   :  { %v392_v44 = vsel %vm243_vm1, %v522_v42, 0.0 }
 0x197   :  { %525 = vpow2.f32 %v390_v43  ;;  %393 = vadd.xlane.f32.xlu0 %v392_v44  ;;  %v249_v45 = vpop.xlane.xlu0 %248 }
 0x198   :  { %v251_v46 = vsub.f32 %v240_v32, %v249_v45 }
 0x19a   :  { %v524_v47 = vpop.eup %523  ;;  %v254_v48 = vmul.f32 1.442695, %v251_v46 }
 0x19b   :  { %508 = vmatmul.msk.f32.vlgmr.msra.gmra.mxu2 %vm243_vm1, %v524_v47  ;;  %v256_v49 = vsel %vm243_vm1, %v524_v47, 0.0 }
 0x19c   :  { %527 = vpow2.f32 %v254_v48  ;;  %257 = vadd.xlane.f32.xlu2 %v256_v49 }
 0x19d   :  { %v526_v50 = vpop.eup %525 }
 0x19e   :  { %v395_v51 = vsel %vm243_vm1, %v526_v50, 0.0 }
 0x19f   :  { %396 = vadd.xlane.f32.xlu1 %v395_v51 }
 0x1a2   :  { %v528_v52 = vpop.eup %527 }
 0x1a3   :  { %509 = vmatmul.msk.f32.vlgmr.msra.gmra.mxu3 %vm243_vm1, %v528_v52  ;;  %510 = vmatmul.msk.f32.vlgmr.msrb.gmra.mxu2 %vm243_vm1, %v522_v42  ;;  %v259_v53 = vsel %vm243_vm1, %v528_v52, 0.0 }
 0x1a4   :  { %260 = vadd.xlane.f32.xlu2 %v259_v53 }
 0x1ab   :  { %511 = vmatmul.msk.f32.vlgmr.msrb.gmra.mxu3 %vm243_vm1, %v526_v50 }
 0x20a   :  { %v394_v54 = vpop.xlane.xlu0 %393 }
 0x20b   :  { %529 = vrcp.f32 %v394_v54  ;;  %v455_v14 = vand.u32 2147483648, %v394_v54  ;;  %vm449_vm7 = vweird.f32 %v394_v54  ;;  %v453_v18 = vand.u32 2147483647, %v394_v54 }
 0x20d   :  { %v456_v24 = vor.u32 1.1754944e-38, %v455_v14  ;;  %vm454_vm11 = vcmp.eq.f32.partialorder %v453_v18, 8.507059e+37 }
 0x20f   :  { %v258_v55 = vpop.xlane.xlu2 %257 }
 0x210   :  { %531 = vrcp.f32 %v258_v55  ;;  %v317_v1 = vand.u32 2147483647, %v258_v55  ;;  %v319_v2 = vand.u32 2147483648, %v258_v55  ;;  %vm313_vm3 = vweird.f32 %v258_v55 }
 0x211   :  { %v530_v56 = vpop.eup %529 }
 0x212   :  { %v669_v57 = vpop.xlane.xlu1 %396  ;;  %v445_v58 = vmul.f32 %v530_v56, %v394_v54  ;;  %vm318_vm5 = vcmp.eq.f32.partialorder %v317_v1, 8.507059e+37  ;;  %v320_v9 = vor.u32 1.1754944e-38, %v319_v2  ;;  %vm450_vm6 = vweird.f32 %v530_v56 }
 0x213   :  { %533 = vrcp.f32 %v669_v57  ;;  %vm451_vm8 = vmor %vm449_vm7, %vm450_vm6  ;;  %v469_v33 = vand.u32 2147483648, %v669_v57  ;;  %vm463_vm15 = vweird.f32 %v669_v57  ;;  %v467_v36 = vand.u32 2147483647, %v669_v57 }
 0x214   :  { %v446_v60 = vsub.f32 1.0, %v445_v58 }
 0x215   :  { %v470_v38 = vor.u32 1.1754944e-38, %v469_v33  ;;  %vm468_vm1 = vcmp.eq.f32.partialorder %v467_v36, 8.507059e+37 }
 0x216   :  { %v532_v59 = vpop.eup %531  ;;  %v447_v3 = vmul.f32 %v530_v56, %v446_v60 }
 0x217   :  { %v309_v61 = vmul.f32 %v532_v59, %v258_v55  ;;  %v261_v62 = vpop.xlane.xlu2 %260  ;;  %vm314_vm2 = vweird.f32 %v532_v59 }
 0x218   :  { %535 = vrcp.f32 %v261_v62  ;;  %vm315_vm4 = vmor %vm313_vm3, %vm314_vm2  ;;  %v448_v13 = vadd.f32 %v530_v56, %v447_v3  ;;  %v333_v19 = vand.u32 2147483648, %v261_v62  ;;  %v331_v20 = vand.u32 2147483647, %v261_v62 }
 0x219   :  { %v672_v63 = vpop.eup %533  ;;  %v310_v0 = vsub.f32 1.0, %v309_v61  ;;  %vm327_vm10 = vweird.f32 %v261_v62 }
 0x21a   :  { %v459_v4 = vmul.f32 %v672_v63, %v669_v57  ;;  %v452_v23 = vsel %vm451_vm8, %v530_v56, %v448_v13  ;;  %v334_v27 = vor.u32 1.1754944e-38, %v333_v19  ;;  %vm464_vm13 = vweird.f32 %v672_v63 }
 0x21b   :  { %v311_v5 = vmul.f32 %v532_v59, %v310_v0  ;;  %v457_v29 = vsel %vm454_vm11, %v456_v24, %v452_v23  ;;  %vm332_vm14 = vcmp.eq.f32.partialorder %v331_v20, 8.507059e+37  ;;  %vm465_vm0 = vmor %vm463_vm15, %vm464_vm13 }
 0x21c   :  { %v460_v10 = vsub.f32 1.0, %v459_v4 }
 0x21d   :  { %v312_v6 = vadd.f32 %v532_v59, %v311_v5 }
 0x21e   :  { %v536_v7 = vpop.eup %535  ;;  %v282_v8 = vpop.f32.mrf.mxu2  ;;  %v461_v21 = vmul.f32 %v672_v63, %v460_v10 }
 0x21f   :  { %v323_v11 = vmul.f32 %v536_v7, %v261_v62  ;;  %v316_v12 = vsel %vm315_vm4, %v532_v59, %v312_v6  ;;  %vm328_vm9 = vweird.f32 %v536_v7 }
 0x220   :  { %v321_v15 = vsel %vm318_vm5, %v320_v9, %v316_v12  ;;  %vm329_vm12 = vmor %vm327_vm10, %vm328_vm9  ;;  %v462_v32 = vadd.f32 %v672_v63, %v461_v21 }
 0x221   :  { %v324_v16 = vsub.f32 1.0, %v323_v11  ;;  %v336_v17 = vmul.f32 %v321_v15, %v282_v8 }
 0x222   :  { %v466_v37 = vsel %vm465_vm0, %v672_v63, %v462_v32 }
 0x223   :  { %v325_v22 = vmul.f32 %v536_v7, %v324_v16  ;;  %338 = vst [vmem:[#allocation7] sm:$0xff] %v336_v17  ;;  %v471_v40 = vsel %vm468_vm1, %v470_v38, %v466_v37 }
 0x225   :  { %v326_v25 = vadd.f32 %v536_v7, %v325_v22 }
 0x226   :  { %v305_v26 = vpop.f32.mrf.mxu3  ;;  %v418_v28 = vpop.f32.mrf.mxu2 }
 0x227   :  { %v330_v30 = vsel %vm329_vm12, %v536_v7, %v326_v25  ;;  %v472_v31 = vmul.f32 %v457_v29, %v418_v28 }
 0x228   :  { %v335_v34 = vsel %vm332_vm14, %v334_v27, %v330_v30 }
 0x229   :  { %v337_v35 = vmul.f32 %v335_v34, %v305_v26  ;;  %474 = vst [vmem:[#allocation7 + $0x8] sm:$0xff] %v472_v31 }
 0x22b   :  { %339 = vst [vmem:[#allocation7 + $0x10] sm:$0xff] %v337_v35 }
 0x22e   :  { %v441_v39 = vpop.f32.mrf.mxu3 }
 0x22f   :  { %v473_v41 = vmul.f32 %v471_v40, %v441_v39 }
 0x231   :  { %475 = vst [vmem:[#allocation7 + $0x18] sm:$0xff] %v473_v41 }
 0x232   :  { %488 = dma.vmem_to_hbm [thread:$0]  %s481_s1, 512, %s483_s25, [#allocation4], %s622_s26, %s622_s26, %s623_s27  }
 0x233   :  { %613 = dma.done.wait [#allocation4], 512  }
 0x234   :  { %614 = vsyncadd [#allocation4], 4294966784 }
 0x235   :  { %493 = vsyncpa [#allocation3], 1 }
 0x236   :  { %494 = vsyncpa [#allocation6], 1 }
 0x237   :  { %495 = vsyncpa [#allocation4], 1 }

</bundles_post_ra>
